<compile_context>
chip_gen: v7x
topology: tpu7x:2x2x1
jax: 0.10.0
libtpu: 0.0.40
codegen_flags: <defaults>
</compile_context>

<pallas_src>
import jax
import jax.numpy as jnp
from jax import lax
from jax.experimental import pallas as pl
from jax.experimental.pallas import tpu as pltpu

GP = 128  # per-gate lane-aligned width


def lmdgnn_kernel(
    x_ref,                                   # [B, N]  float32 features
    we1_ref, be1_ref, we2_ref, be2_ref,      # encoder: [N,H],[1,H],[H,E],[1,E]
    wx_ref, bx_ref,                          # fused x-gate weights [E,3*GP], bias [1,3*GP]
    uu_ref,                                  # fused recurrent weights [GP,3*GP] (i|o|c)
    wd1_ref, bd1_ref, wd2_ref, bd2_ref,      # decoder: [GP,H],[1,H],[H,GP],[1,GP]
    out_ref,                                 # [B, GP]
    xz_scr,                                  # VMEM scratch [B, 3*GP]
    h_scr,                                   # VMEM scratch [B, GP]
):
    x = x_ref[...]
    B = out_ref.shape[0]
    gp = uu_ref.shape[0]                     # = GP (128)

    # ---- Encoder: Linear+ReLU, Linear+ReLU ----
    z = jnp.maximum(
        jnp.dot(x, we1_ref[...], preferred_element_type=jnp.float32) + be1_ref[...], 0.0)
    e = jnp.maximum(
        jnp.dot(z, we2_ref[...], preferred_element_type=jnp.float32) + be2_ref[...], 0.0)

    # ---- One fused matmul for the x-contribution of every gate (both W-side and
    #      U-side biases are folded into bx; i/o columns already scaled by 0.5).
    #      Staged in VMEM so the per-step read is a cheap static-row vld.
    xz_scr[...] = (
        jnp.dot(e, wx_ref[...], preferred_element_type=jnp.float32) + bx_ref[...])

    # ---- Hoisted gate-fixup constants: i/o blocks get 0.5*t + 0.5 (sigmoid via
    #      tanh); the c block passes through (tanh).
    lane = lax.broadcasted_iota(jnp.int32, (1, 3 * gp), 1)
    g_scale = jnp.where(lane < 2 * gp, 0.5, 1.0).astype(jnp.float32)
    g_shift = jnp.where(lane < 2 * gp, 0.5, 0.0).astype(jnp.float32)

    U = uu_ref[...]                          # [GP, 3*GP]

    # ---- MLSTM: one shared stateful cell -> sequential scan over batch rows.
    #      Fully unrolled (B is compile-time const); per step: one MXU dot, one
    #      vld, one fused tanh + one tanh on the EUP, VPU mul/adds, one vst.
    h = jnp.zeros((1, gp), jnp.float32)      # padded lanes stay exactly 0
    for b in range(B):
        g = jnp.dot(h, U, preferred_element_type=jnp.float32) + xz_scr[b:b + 1, :]
        t = jnp.tanh(g)                      # single EUP push for all three gates
        f = t * g_scale + g_shift            # i/o -> sigmoid, c -> tanh
        i_g = f[:, 0:gp]                     # vreg-boundary slices (free selects)
        o_g = f[:, gp:2 * gp]
        c_t = f[:, 2 * gp:3 * gp]
        h = o_g * jnp.tanh(i_g * c_t)        # memory_cell = i_g * c_t
        h_scr[b:b + 1, :] = h                # lane-dense store, off critical path

    h_all = h_scr[...]                       # [B, GP] (padded lanes are zero)

    # ---- Decoder: Linear+ReLU, Linear (wd1 rows >= E are zero, wd2 cols >= N zero) ----
    d1 = jnp.maximum(
        jnp.dot(h_all, wd1_ref[...], preferred_element_type=jnp.float32) + bd1_ref[...], 0.0)
    out_ref[...] = (
        jnp.dot(d1, wd2_ref[...], preferred_element_type=jnp.float32) + bd2_ref[...])


def init_params(key, input_size, hidden_size, emb_size):
    """Deterministic PyTorch-Linear-style init: U(-1/sqrt(fan_in), 1/sqrt(fan_in))."""
    def linear(k, fan_in, fan_out):
        kw, kb = jax.random.split(k)
        lim = 1.0 / jnp.sqrt(float(fan_in))
        w = jax.random.uniform(kw, (fan_in, fan_out), jnp.float32, -lim, lim)
        b = jax.random.uniform(kb, (1, fan_out), jnp.float32, -lim, lim)
        return w, b

    ks = jax.random.split(key, 10)
    p = {}
    p["we1"], p["be1"] = linear(ks[0], input_size, hidden_size)
    p["we2"], p["be2"] = linear(ks[1], hidden_size, emb_size)
    p["iu_w"], p["iu_b"] = linear(ks[2], emb_size, emb_size)
    p["iw_w"], p["iw_b"] = linear(ks[3], emb_size, emb_size)
    p["ou_w"], p["ou_b"] = linear(ks[4], emb_size, emb_size)
    p["ow_w"], p["ow_b"] = linear(ks[5], emb_size, emb_size)
    p["cu_w"], p["cu_b"] = linear(ks[6], emb_size, emb_size)
    p["cw_w"], p["cw_b"] = linear(ks[7], emb_size, emb_size)
    p["wd1"], p["bd1"] = linear(ks[8], emb_size, hidden_size)
    p["wd2"], p["bd2"] = linear(ks[9], hidden_size, input_size)
    return p


def lmdgnn_forward(x, params, input_size, emb_size):
    B = x.shape[0]
    x_feat = x[:, :input_size].astype(jnp.float32)
    # nodes_i = x[:, input_size]  # indexes a list of aliased MLSTMs -> no effect on output

    p = params
    E = emb_size
    H = p["we1"].shape[1]

    def pad_cols(w, width):
        return jnp.pad(w, ((0, 0), (0, width - w.shape[1])))

    # Lane-aligned gate fusion (order i | o | c), each block zero-padded to GP=128
    # lanes; i/o blocks (weights AND both biases) pre-scaled by 0.5 so the kernel
    # recovers sigmoid from a single fused tanh.
    wx = jnp.concatenate([pad_cols(0.5 * p["iw_w"], GP),
                          pad_cols(0.5 * p["ow_w"], GP),
                          pad_cols(p["cw_w"], GP)], axis=1)                 # [E, 3*GP]
    bx = jnp.concatenate([pad_cols(0.5 * (p["iw_b"] + p["iu_b"]), GP),
                          pad_cols(0.5 * (p["ow_b"] + p["ou_b"]), GP),
                          pad_cols(p["cw_b"] + p["cu_b"], GP)], axis=1)     # [1, 3*GP]
    uu = jnp.concatenate([pad_cols(0.5 * p["iu_w"], GP),
                          pad_cols(0.5 * p["ou_w"], GP),
                          pad_cols(p["cu_w"], GP)], axis=1)                 # [E, 3*GP]
    uu = jnp.pad(uu, ((0, GP - E), (0, 0)))                                 # [GP, 3*GP]

    wd1 = jnp.pad(p["wd1"], ((0, GP - E), (0, 0)))                          # [GP, H]
    wd2 = pad_cols(p["wd2"], GP)                                            # [H, GP]
    bd2 = pad_cols(p["bd2"], GP)                                            # [1, GP]

    args = [
        x_feat,
        p["we1"], p["be1"], p["we2"], p["be2"],
        wx, bx, uu,
        wd1, p["bd1"], wd2, bd2,
    ]
    vmem = pl.BlockSpec(memory_space=pltpu.MemorySpace.VMEM)
    out_padded = pl.pallas_call(
        lmdgnn_kernel,
        out_shape=jax.ShapeDtypeStruct((B, GP), jnp.float32),
        in_specs=[vmem] * len(args),
        out_specs=vmem,
        scratch_shapes=[pltpu.VMEM((B, 3 * GP), jnp.float32),
                        pltpu.VMEM((B, GP), jnp.float32)],
    )(*args)
    return out_padded[:, :input_size]


def reference(x, params, input_size):
    """Pure-JAX re-implementation of the PyTorch forward for verification."""
    p = params
    xf = x[:, :input_size].astype(jnp.float32)
    z = jnp.maximum(xf @ p["we1"] + p["be1"], 0.0)
    e = jnp.maximum(z @ p["we2"] + p["be2"], 0.0)
    E = p["we2"].shape[1]
    h = jnp.zeros((1, E), jnp.float32)
    rows = []
    for b in range(xf.shape[0]):
        xb = e[b:b + 1]
        i_g = jax.nn.sigmoid(h @ p["iu_w"] + p["iu_b"] + xb @ p["iw_w"] + p["iw_b"])
        o_g = jax.nn.sigmoid(h @ p["ou_w"] + p["ou_b"] + xb @ p["ow_w"] + p["ow_b"])
        c_t = jnp.tanh(h @ p["cu_w"] + p["cu_b"] + xb @ p["cw_w"] + p["cw_b"])
        h = o_g * jnp.tanh(i_g * c_t)
        rows.append(h)
    hall = jnp.concatenate(rows, axis=0)
    d1 = jnp.maximum(hall @ p["wd1"] + p["bd1"], 0.0)
    return d1 @ p["wd2"] + p["bd2"]


if __name__ == "__main__":
    INPUT_SIZE = 16   # num_nodes / feature dim
    HIDDEN_SIZE = 32
    EMB_SIZE = 8
    BATCH = 4

    key = jax.random.PRNGKey(0)
    k_x, k_idx, k_p = jax.random.split(key, 3)

    feats = jax.random.normal(k_x, (BATCH, INPUT_SIZE), jnp.float32)
    nodes_i = jax.random.randint(k_idx, (BATCH, 1), 0, INPUT_SIZE).astype(jnp.float32)
    x = jnp.concatenate([feats, nodes_i], axis=1)   # [B, input_size + 1]

    params = init_params(k_p, INPUT_SIZE, HIDDEN_SIZE, EMB_SIZE)

    out = lmdgnn_forward(x, params, INPUT_SIZE, EMB_SIZE)
    out = jax.block_until_ready(out)

    ref = reference(x, params, INPUT_SIZE)
    assert out.shape == (BATCH, INPUT_SIZE)
    assert jnp.allclose(out, ref, rtol=1e-3, atol=1e-3)
    print("KERNEL_OK")
</pallas_src>

<mosaic_0001>
module attributes {stable_mosaic.version = 11 : i64} {
  func.func @lmdgnn_kernel(%arg0: memref<4x16xf32, #tpu.memory_space<vmem>>, %arg1: memref<16x32xf32, #tpu.memory_space<vmem>>, %arg2: memref<1x32xf32, #tpu.memory_space<vmem>>, %arg3: memref<32x8xf32, #tpu.memory_space<vmem>>, %arg4: memref<1x8xf32, #tpu.memory_space<vmem>>, %arg5: memref<8x384xf32, #tpu.memory_space<vmem>>, %arg6: memref<1x384xf32, #tpu.memory_space<vmem>>, %arg7: memref<128x384xf32, #tpu.memory_space<vmem>>, %arg8: memref<128x32xf32, #tpu.memory_space<vmem>>, %arg9: memref<1x32xf32, #tpu.memory_space<vmem>>, %arg10: memref<32x128xf32, #tpu.memory_space<vmem>>, %arg11: memref<1x128xf32, #tpu.memory_space<vmem>>, %arg12: memref<4x128xf32, #tpu.memory_space<vmem>>, %arg13: memref<4x384xf32, #tpu.memory_space<vmem>>, %arg14: memref<4x128xf32, #tpu.memory_space<vmem>>) attributes {dimension_semantics = [], scalar_prefetch = 0 : i64, scratch_operands = 2 : i64, tpu.core_type = #tpu.core_type<tc>} {
    %c0 = arith.constant 0 : index
    %c0_0 = arith.constant 0 : index
    %0 = vector.load %arg0[%c0, %c0_0] : memref<4x16xf32, #tpu.memory_space<vmem>>, vector<4x16xf32>
    %c0_1 = arith.constant 0 : index
    %c0_2 = arith.constant 0 : index
    %1 = vector.load %arg1[%c0_1, %c0_2] : memref<16x32xf32, #tpu.memory_space<vmem>>, vector<16x32xf32>
    %cst = arith.constant dense<0.000000e+00> : vector<4x32xf32>
    %2 = tpu.matmul %0, %1, %cst {dimension_numbers = #tpu.dot_dimension_numbers<[1], [0], [0], [1], [0, 0, 1, 1], [], []>} : vector<4x16xf32>, vector<16x32xf32>, vector<4x32xf32> -> vector<4x32xf32>
    %c0_3 = arith.constant 0 : index
    %c0_4 = arith.constant 0 : index
    %3 = vector.load %arg2[%c0_3, %c0_4] : memref<1x32xf32, #tpu.memory_space<vmem>>, vector<1x32xf32>
    %4 = vector.broadcast %3 : vector<1x32xf32> to vector<4x32xf32>
    %5 = arith.addf %2, %4 : vector<4x32xf32>
    %cst_5 = arith.constant 0.000000e+00 : f32
    %6 = vector.broadcast %cst_5 : f32 to vector<4x32xf32>
    %7 = arith.maximumf %5, %6 : vector<4x32xf32>
    %c0_6 = arith.constant 0 : index
    %c0_7 = arith.constant 0 : index
    %8 = vector.load %arg3[%c0_6, %c0_7] : memref<32x8xf32, #tpu.memory_space<vmem>>, vector<32x8xf32>
    %cst_8 = arith.constant dense<0.000000e+00> : vector<4x8xf32>
    %9 = tpu.matmul %7, %8, %cst_8 {dimension_numbers = #tpu.dot_dimension_numbers<[1], [0], [0], [1], [0, 0, 1, 1], [], []>} : vector<4x32xf32>, vector<32x8xf32>, vector<4x8xf32> -> vector<4x8xf32>
    %c0_9 = arith.constant 0 : index
    %c0_10 = arith.constant 0 : index
    %10 = vector.load %arg4[%c0_9, %c0_10] : memref<1x8xf32, #tpu.memory_space<vmem>>, vector<1x8xf32>
    %11 = vector.broadcast %10 : vector<1x8xf32> to vector<4x8xf32>
    %12 = arith.addf %9, %11 : vector<4x8xf32>
    %cst_11 = arith.constant 0.000000e+00 : f32
    %13 = vector.broadcast %cst_11 : f32 to vector<4x8xf32>
    %14 = arith.maximumf %12, %13 : vector<4x8xf32>
    %c0_12 = arith.constant 0 : index
    %c0_13 = arith.constant 0 : index
    %15 = vector.load %arg5[%c0_12, %c0_13] : memref<8x384xf32, #tpu.memory_space<vmem>>, vector<8x384xf32>
    %cst_14 = arith.constant dense<0.000000e+00> : vector<4x384xf32>
    %16 = tpu.matmul %14, %15, %cst_14 {dimension_numbers = #tpu.dot_dimension_numbers<[1], [0], [0], [1], [0, 0, 1, 1], [], []>} : vector<4x8xf32>, vector<8x384xf32>, vector<4x384xf32> -> vector<4x384xf32>
    %c0_15 = arith.constant 0 : index
    %c0_16 = arith.constant 0 : index
    %17 = vector.load %arg6[%c0_15, %c0_16] : memref<1x384xf32, #tpu.memory_space<vmem>>, vector<1x384xf32>
    %18 = vector.broadcast %17 : vector<1x384xf32> to vector<4x384xf32>
    %19 = arith.addf %16, %18 : vector<4x384xf32>
    %c0_17 = arith.constant 0 : index
    %c0_18 = arith.constant 0 : index
    %20 = vector.load %arg13[%c0_17, %c0_18] : memref<4x384xf32, #tpu.memory_space<vmem>>, vector<4x384xf32>
    tpu.vector_store %arg13[%c0_17, %c0_18], %19 {strides = array<i32>} : memref<4x384xf32, #tpu.memory_space<vmem>>, vector<4x384xf32>,
    %21 = tpu.iota {dimensions = array<i32: 1>} : vector<1x384xi32>
    %c256_i32 = arith.constant 256 : i32
    %22 = vector.broadcast %c256_i32 : i32 to vector<1x384xi32>
    %23 = arith.cmpi slt, %21, %22 : vector<1x384xi32>
    %cst_19 = arith.constant 5.000000e-01 : f32
    %cst_20 = arith.constant 1.000000e+00 : f32
    %24 = vector.broadcast %cst_19 : f32 to vector<1x384xf32>
    %25 = vector.broadcast %cst_20 : f32 to vector<1x384xf32>
    %26 = arith.select %23, %24, %25 : vector<1x384xi1>, vector<1x384xf32>
    %c256_i32_21 = arith.constant 256 : i32
    %27 = vector.broadcast %c256_i32_21 : i32 to vector<1x384xi32>
    %28 = arith.cmpi slt, %21, %27 : vector<1x384xi32>
    %cst_22 = arith.constant 5.000000e-01 : f32
    %cst_23 = arith.constant 0.000000e+00 : f32
    %29 = vector.broadcast %cst_22 : f32 to vector<1x384xf32>
    %30 = vector.broadcast %cst_23 : f32 to vector<1x384xf32>
    %31 = arith.select %28, %29, %30 : vector<1x384xi1>, vector<1x384xf32>
    %c0_24 = arith.constant 0 : index
    %c0_25 = arith.constant 0 : index
    %32 = vector.load %arg7[%c0_24, %c0_25] : memref<128x384xf32, #tpu.memory_space<vmem>>, vector<128x384xf32>
    %cst_26 = arith.constant 0.000000e+00 : f32
    %33 = vector.broadcast %cst_26 : f32 to vector<1x128xf32>
    %cst_27 = arith.constant dense<0.000000e+00> : vector<1x384xf32>
    %34 = tpu.matmul %33, %32, %cst_27 {dimension_numbers = #tpu.dot_dimension_numbers<[1], [0], [0], [1], [0, 0, 1, 1], [], []>} : vector<1x128xf32>, vector<128x384xf32>, vector<1x384xf32> -> vector<1x384xf32>
    %c0_28 = arith.constant 0 : index
    %c0_29 = arith.constant 0 : index
    %35 = vector.load %arg13[%c0_28, %c0_29] : memref<4x384xf32, #tpu.memory_space<vmem>>, vector<1x384xf32>
    %36 = arith.addf %34, %35 : vector<1x384xf32>
    %37 = math.tanh %36 : vector<1x384xf32>
    %38 = arith.mulf %37, %26 : vector<1x384xf32>
    %39 = arith.addf %38, %31 : vector<1x384xf32>
    %40 = vector.extract_strided_slice %39 {offsets = [0, 0], sizes = [1, 128], strides = [1, 1]} : vector<1x384xf32> to vector<1x128xf32>
    %41 = vector.extract_strided_slice %39 {offsets = [0, 128], sizes = [1, 128], strides = [1, 1]} : vector<1x384xf32> to vector<1x128xf32>
    %42 = vector.extract_strided_slice %39 {offsets = [0, 256], sizes = [1, 128], strides = [1, 1]} : vector<1x384xf32> to vector<1x128xf32>
    %43 = arith.mulf %40, %42 : vector<1x128xf32>
    %44 = math.tanh %43 : vector<1x128xf32>
    %45 = arith.mulf %41, %44 : vector<1x128xf32>
    %c0_30 = arith.constant 0 : index
    %c0_31 = arith.constant 0 : index
    %46 = vector.load %arg14[%c0_30, %c0_31] : memref<4x128xf32, #tpu.memory_space<vmem>>, vector<1x128xf32>
    tpu.vector_store %arg14[%c0_30, %c0_31], %45 {strides = array<i32>} : memref<4x128xf32, #tpu.memory_space<vmem>>, vector<1x128xf32>,
    %cst_32 = arith.constant dense<0.000000e+00> : vector<1x384xf32>
    %47 = tpu.matmul %45, %32, %cst_32 {dimension_numbers = #tpu.dot_dimension_numbers<[1], [0], [0], [1], [0, 0, 1, 1], [], []>} : vector<1x128xf32>, vector<128x384xf32>, vector<1x384xf32> -> vector<1x384xf32>
    %c1 = arith.constant 1 : index
    %c0_33 = arith.constant 0 : index
    %48 = vector.load %arg13[%c1, %c0_33] : memref<4x384xf32, #tpu.memory_space<vmem>>, vector<1x384xf32>
    %49 = arith.addf %47, %48 : vector<1x384xf32>
    %50 = math.tanh %49 : vector<1x384xf32>
    %51 = arith.mulf %50, %26 : vector<1x384xf32>
    %52 = arith.addf %51, %31 : vector<1x384xf32>
    %53 = vector.extract_strided_slice %52 {offsets = [0, 0], sizes = [1, 128], strides = [1, 1]} : vector<1x384xf32> to vector<1x128xf32>
    %54 = vector.extract_strided_slice %52 {offsets = [0, 128], sizes = [1, 128], strides = [1, 1]} : vector<1x384xf32> to vector<1x128xf32>
    %55 = vector.extract_strided_slice %52 {offsets = [0, 256], sizes = [1, 128], strides = [1, 1]} : vector<1x384xf32> to vector<1x128xf32>
    %56 = arith.mulf %53, %55 : vector<1x128xf32>
    %57 = math.tanh %56 : vector<1x128xf32>
    %58 = arith.mulf %54, %57 : vector<1x128xf32>
    %c1_34 = arith.constant 1 : index
    %c0_35 = arith.constant 0 : index
    %59 = vector.load %arg14[%c1_34, %c0_35] : memref<4x128xf32, #tpu.memory_space<vmem>>, vector<1x128xf32>
    tpu.vector_store %arg14[%c1_34, %c0_35], %58 {strides = array<i32>} : memref<4x128xf32, #tpu.memory_space<vmem>>, vector<1x128xf32>,
    %cst_36 = arith.constant dense<0.000000e+00> : vector<1x384xf32>
    %60 = tpu.matmul %58, %32, %cst_36 {dimension_numbers = #tpu.dot_dimension_numbers<[1], [0], [0], [1], [0, 0, 1, 1], [], []>} : vector<1x128xf32>, vector<128x384xf32>, vector<1x384xf32> -> vector<1x384xf32>
    %c2 = arith.constant 2 : index
    %c0_37 = arith.constant 0 : index
    %61 = vector.load %arg13[%c2, %c0_37] : memref<4x384xf32, #tpu.memory_space<vmem>>, vector<1x384xf32>
    %62 = arith.addf %60, %61 : vector<1x384xf32>
    %63 = math.tanh %62 : vector<1x384xf32>
    %64 = arith.mulf %63, %26 : vector<1x384xf32>
    %65 = arith.addf %64, %31 : vector<1x384xf32>
    %66 = vector.extract_strided_slice %65 {offsets = [0, 0], sizes = [1, 128], strides = [1, 1]} : vector<1x384xf32> to vector<1x128xf32>
    %67 = vector.extract_strided_slice %65 {offsets = [0, 128], sizes = [1, 128], strides = [1, 1]} : vector<1x384xf32> to vector<1x128xf32>
    %68 = vector.extract_strided_slice %65 {offsets = [0, 256], sizes = [1, 128], strides = [1, 1]} : vector<1x384xf32> to vector<1x128xf32>
    %69 = arith.mulf %66, %68 : vector<1x128xf32>
    %70 = math.tanh %69 : vector<1x128xf32>
    %71 = arith.mulf %67, %70 : vector<1x128xf32>
    %c2_38 = arith.constant 2 : index
    %c0_39 = arith.constant 0 : index
    %72 = vector.load %arg14[%c2_38, %c0_39] : memref<4x128xf32, #tpu.memory_space<vmem>>, vector<1x128xf32>
    tpu.vector_store %arg14[%c2_38, %c0_39], %71 {strides = array<i32>} : memref<4x128xf32, #tpu.memory_space<vmem>>, vector<1x128xf32>,
    %cst_40 = arith.constant dense<0.000000e+00> : vector<1x384xf32>
    %73 = tpu.matmul %71, %32, %cst_40 {dimension_numbers = #tpu.dot_dimension_numbers<[1], [0], [0], [1], [0, 0, 1, 1], [], []>} : vector<1x128xf32>, vector<128x384xf32>, vector<1x384xf32> -> vector<1x384xf32>
    %c3 = arith.constant 3 : index
    %c0_41 = arith.constant 0 : index
    %74 = vector.load %arg13[%c3, %c0_41] : memref<4x384xf32, #tpu.memory_space<vmem>>, vector<1x384xf32>
    %75 = arith.addf %73, %74 : vector<1x384xf32>
    %76 = math.tanh %75 : vector<1x384xf32>
    %77 = arith.mulf %76, %26 : vector<1x384xf32>
    %78 = arith.addf %77, %31 : vector<1x384xf32>
    %79 = vector.extract_strided_slice %78 {offsets = [0, 0], sizes = [1, 128], strides = [1, 1]} : vector<1x384xf32> to vector<1x128xf32>
    %80 = vector.extract_strided_slice %78 {offsets = [0, 128], sizes = [1, 128], strides = [1, 1]} : vector<1x384xf32> to vector<1x128xf32>
    %81 = vector.extract_strided_slice %78 {offsets = [0, 256], sizes = [1, 128], strides = [1, 1]} : vector<1x384xf32> to vector<1x128xf32>
    %82 = arith.mulf %79, %81 : vector<1x128xf32>
    %83 = math.tanh %82 : vector<1x128xf32>
    %84 = arith.mulf %80, %83 : vector<1x128xf32>
    %c3_42 = arith.constant 3 : index
    %c0_43 = arith.constant 0 : index
    %85 = vector.load %arg14[%c3_42, %c0_43] : memref<4x128xf32, #tpu.memory_space<vmem>>, vector<1x128xf32>
    tpu.vector_store %arg14[%c3_42, %c0_43], %84 {strides = array<i32>} : memref<4x128xf32, #tpu.memory_space<vmem>>, vector<1x128xf32>,
    %c0_44 = arith.constant 0 : index
    %c0_45 = arith.constant 0 : index
    %86 = vector.load %arg14[%c0_44, %c0_45] : memref<4x128xf32, #tpu.memory_space<vmem>>, vector<4x128xf32>
    %c0_46 = arith.constant 0 : index
    %c0_47 = arith.constant 0 : index
    %87 = vector.load %arg8[%c0_46, %c0_47] : memref<128x32xf32, #tpu.memory_space<vmem>>, vector<128x32xf32>
    %cst_48 = arith.constant dense<0.000000e+00> : vector<4x32xf32>
    %88 = tpu.matmul %86, %87, %cst_48 {dimension_numbers = #tpu.dot_dimension_numbers<[1], [0], [0], [1], [0, 0, 1, 1], [], []>} : vector<4x128xf32>, vector<128x32xf32>, vector<4x32xf32> -> vector<4x32xf32>
    %c0_49 = arith.constant 0 : index
    %c0_50 = arith.constant 0 : index
    %89 = vector.load %arg9[%c0_49, %c0_50] : memref<1x32xf32, #tpu.memory_space<vmem>>, vector<1x32xf32>
    %90 = vector.broadcast %89 : vector<1x32xf32> to vector<4x32xf32>
    %91 = arith.addf %88, %90 : vector<4x32xf32>
    %cst_51 = arith.constant 0.000000e+00 : f32
    %92 = vector.broadcast %cst_51 : f32 to vector<4x32xf32>
    %93 = arith.maximumf %91, %92 : vector<4x32xf32>
    %c0_52 = arith.constant 0 : index
    %c0_53 = arith.constant 0 : index
    %94 = vector.load %arg10[%c0_52, %c0_53] : memref<32x128xf32, #tpu.memory_space<vmem>>, vector<32x128xf32>
    %cst_54 = arith.constant dense<0.000000e+00> : vector<4x128xf32>
    %95 = tpu.matmul %93, %94, %cst_54 {dimension_numbers = #tpu.dot_dimension_numbers<[1], [0], [0], [1], [0, 0, 1, 1], [], []>} : vector<4x32xf32>, vector<32x128xf32>, vector<4x128xf32> -> vector<4x128xf32>
    %c0_55 = arith.constant 0 : index
    %c0_56 = arith.constant 0 : index
    %96 = vector.load %arg11[%c0_55, %c0_56] : memref<1x128xf32, #tpu.memory_space<vmem>>, vector<1x128xf32>
    %97 = vector.broadcast %96 : vector<1x128xf32> to vector<4x128xf32>
    %98 = arith.addf %95, %97 : vector<4x128xf32>
    %c0_57 = arith.constant 0 : index
    %c0_58 = arith.constant 0 : index
    %99 = vector.load %arg12[%c0_57, %c0_58] : memref<4x128xf32, #tpu.memory_space<vmem>>, vector<4x128xf32>
    tpu.vector_store %arg12[%c0_57, %c0_58], %98 {strides = array<i32>} : memref<4x128xf32, #tpu.memory_space<vmem>>, vector<4x128xf32>,
    return
  }
}

</mosaic_0001>

<bundles_post_ra>
// kernel: tpu_custom_call.1
= control target key start
LH: loop header
LB: loop body
LE: loop exit
PB: predicated region body
PF: predicated region fallthrough
CT: control target
= control target key end

     0   :  { %17 = vsyncpa [#allocation5], 0  ;;  %s2448_s0 = inlined_call_operand.vmem [shape: f32[4,16], index: 0, kind: input, shape index: {}]   ;;  %s2449_s1 = inlined_call_operand.vmem [shape: f32[16,32], index: 1, kind: input, shape index: {}]   ;;  %s2450_s2 = inlined_call_operand.vmem [shape: f32[1,32], index: 2, kind: input, shape index: {}]   ;;  %s2451_s3 = inlined_call_operand.vmem [shape: f32[32,8], index: 3, kind: input, shape index: {}]   ;;  %s2452_s4 = inlined_call_operand.vmem [shape: f32[1,8], index: 4, kind: input, shape index: {}]   ;;  %s2453_s5 = inlined_call_operand.vmem [shape: f32[8,384], index: 5, kind: input, shape index: {}]   ;;  %s2454_s6 = inlined_call_operand.vmem [shape: f32[1,384], index: 6, kind: input, shape index: {}]   ;;  %s2455_s7 = inlined_call_operand.hbm [shape: f32[128,384], index: 7, kind: input, shape index: {}]   ;;  %s2456_s8 = inlined_call_operand.vmem [shape: f32[128,32], index: 8, kind: input, shape index: {}]   ;;  %s2457_s9 = inlined_call_operand.vmem [shape: f32[1,32], index: 9, kind: input, shape index: {}]   ;;  %s2458_s10 = inlined_call_operand.vmem [shape: f32[32,128], index: 10, kind: input, shape index: {}]   ;;  %s2459_s11 = inlined_call_operand.vmem [shape: f32[1,128], index: 11, kind: input, shape index: {}]   ;;  %s2460_s12 = inlined_call_operand.hbm [shape: f32[4,128], index: 12, kind: output, shape index: {}]  }
   0x1   :  { %18 = vsyncpa [#allocation6], 0  ;;  %s2009_s21 = smov [#allocation4]   ;;  %s1961_s25 = scalar_lea.hbm %s2455_s7, 6144 }
   0x2   :  { %s38_s22 = sshll.u32 %s2009_s21, 4  ;;  %p1962_p0 = scmp.ne.s32.totalorder %s2455_s7, %s1961_s25  ;;  %s39_s22 = int_to_ptr.vmem [resolvable:$true] %s38_s22 }
   0x3   :  { %p1965_p1 = scmp.lt.u32.totalorder %s1961_s25, %s2455_s7 }
   0x5   :  { %p1967_p2 = pnand %p1965_p1, %p1962_p0 }
   0x7   :  { %1970 = shalt.err (!%p1967_p2)
}
   0x8   :  { %s1971_s30 = scalar_lea.vmem %s39_s22, 6144  ;;  %p1976_p4 = scmp.lt.s32.totalorder %s39_s22, %s39_s22 }
   0x9   :  { %p1972_p3 = scmp.ne.s32.totalorder %s39_s22, %s1971_s30  ;;  %p1977_p5 = scmp.lt.s32.totalorder %s1971_s30, %s1971_s30 }
   0xb   :  { %p1978_p6 = por %p1977_p5, %p1976_p4 }
   0xd   :  { %p1979_p7 = pnand %p1978_p6, %p1972_p3 }
   0xf   :  { %1982 = shalt.err (!%p1979_p7)
}
  0x10   :  { %s2010_s13 = smov 384   ;;  %s2011_s14 = smov 24  }
  0x11   :  { %44 = dma.hbm_to_vmem [thread:$0]  %s2455_s7, 6144, %s39_s22, [#allocation5], %s2010_s13, %s2010_s13, %s2011_s14  }
  0x12   :  { %2005 = dma.done.wait [#allocation5], 6144  }
  0x13   :  { %2006 = vsyncadd [#allocation5], 4294961152  ;;  %v2012_v0 = vmov 0.0|0.0   ;;  %vm2013_vm0 = vmmov 0   ;;  %v2014_v1 = vmov 0.0   ;;  %v57_v2 = vld [vmem:[%s2449_s1] sm:$0xff] }
  0x14   :  { %1659 = vmatprep.subr.bf16.mxu0 %v2012_v0  ;;  %1454 = vmatprep.mubr.msk.f32.mxu0 %vm2013_vm0, %v2014_v1  ;;  %v58_v3 = vld [vmem:[%s2449_s1 + $0x8] sm:$0xff]  ;;  %v141_v5 = vld [vmem:[%s2451_s3] sm:$0xff]  ;;  %vm66_vm1 = vcmask 130048   ;;  %v143_v9 = vld [vmem:[%s2451_s3 + $0x10] sm:$0xff]  ;;  %vm152_vm2 = vcmask 261120   ;;  %vm247_vm3 = vcmask 64512  }
  0x15   :  { %540 = vmatprep.mubr.f32.mxu1 %v2014_v1  ;;  %v1660_v4 = vpack.c.bf16 %v58_v3, %v57_v2  ;;  %v142_v6 = vld [vmem:[%s2451_s3 + $0x8] sm:$0xff]  ;;  %v56_v7 = vld [vmem:[%s2448_s0] sm:$0xf]  ;;  %v144_v10 = vld [vmem:[%s2451_s3 + $0x18] sm:$0xff]  ;;  %s2015_s29 = smov [#allocation7]  }
  0x16   :  { %v1663_v8 = vpack.c.bf16 %v142_v6, %v141_v5  ;;  %v1666_v11 = vpack.c.bf16 %v144_v10, %v143_v9  ;;  %v412_v12 = vld [vmem:[#allocation4 + $0x8] sm:$0xff]  ;;  %v415_v13 = vld [vmem:[#allocation4 + $0x20] sm:$0xff]  ;;  %v414_v16 = vld [vmem:[#allocation4 + $0x18] sm:$0xff]  ;;  %s1332_s30 = sshll.u32 %s2015_s29, 4  ;;  %s1333_s30 = int_to_ptr.vmem [resolvable:$true] %s1332_s30 }
  0x17   :  { %1661 = vmatpush3.bf16.msra.mxu0 %v1660_v4  ;;  %v411_v14 = vld [vmem:[#allocation4] sm:$0xff]  ;;  %v2122_v15 = vpack.c.bf16 %v415_v13, %v412_v12  ;;  %v418_v17 = vld [vmem:[#allocation4 + $0x38] sm:$0xff]  ;;  %v421_v18 = vld [vmem:[#allocation4 + $0x50] sm:$0xff]  ;;  %p1988_p9 = scmp.lt.s32.totalorder %s1333_s30, %s1333_s30 }
  0x18   :  { %1662 = vmatprep.subr.bf16.mxu0 %v2012_v0  ;;  %v2124_v19 = vpack.c.bf16 %v414_v16, %v411_v14  ;;  %v2126_v20 = vpack.c.bf16 %v421_v18, %v418_v17  ;;  %v417_v21 = vld [vmem:[#allocation4 + $0x30] sm:$0xff]  ;;  %v420_v22 = vld [vmem:[#allocation4 + $0x48] sm:$0xff]  ;;  %v427_v24 = vld [vmem:[#allocation4 + $0x80] sm:$0xff] }
  0x19   :  { %v424_v23 = vld [vmem:[#allocation4 + $0x68] sm:$0xff]  ;;  %1669 = vmatprep.subr.bf16.mxu1 %v2122_v15  ;;  %v2130_v25 = vpack.c.bf16 %v420_v22, %v417_v21  ;;  %v423_v27 = vld [vmem:[#allocation4 + $0x60] sm:$0xff]  ;;  %v426_v28 = vld [vmem:[#allocation4 + $0x78] sm:$0xff] }
  0x1a   :  { %1455 = vmatmul.mubr.msk.f32.vlgmr.msra.gmra.mrb[0].mxu0 %vm66_vm1, %v56_v7  ;;  %1671 = vmatpush1.bf16.msra.mxu1 %v2124_v19  ;;  %v2133_v26 = vpack.c.bf16 %v427_v24, %v424_v23  ;;  %v2136_v29 = vpack.c.bf16 %v426_v28, %v423_v27  ;;  %v1341_v30 = vld [vmem:[%s2450_s2] ss:$0 sm:$0xff]  ;;  %v430_v35 = vld [vmem:[#allocation4 + $0x98] sm:$0xff]  ;;  %v432_v39 = vld [vmem:[#allocation4 + $0xa8] sm:$0xff] }
  0x1b   :  { %1664 = vmatpush3.bf16.msra.mxu0 %v1663_v8  ;;  %1465 = vmatprep.mubr.msk.f32.mxu0 %vm2013_vm0, %v2014_v1  ;;  %v433_v36 = vld [vmem:[#allocation4 + $0xb0] sm:$0xff]  ;;  %v436_v41 = vld [vmem:[#allocation4 + $0xc8] sm:$0xff]  ;;  %v439_v42 = vld [vmem:[#allocation4 + $0xe0] sm:$0xff] }
  0x1c   :  { %1665 = vmatprep.subr.bf16.mxu0 %v2012_v0  ;;  %1673 = vmatprep.subr.bf16.mxu1 %v2126_v20  ;;  %v2145_v37 = vpack.c.bf16 %v433_v36, %v430_v35  ;;  %v429_v38 = vld [vmem:[#allocation4 + $0x90] sm:$0xff]  ;;  %v228_v43 = vld [vmem:[%s2453_s5 + $0x8] sm:$0xff]  ;;  %v2154_v44 = vpack.c.bf16 %v439_v42, %v436_v41  ;;  %v435_v45 = vld [vmem:[#allocation4 + $0xc0] sm:$0xff] }
  0x1d   :  { %v2147_v40 = vpack.c.bf16 %v432_v39, %v429_v38  ;;  %v438_v46 = vld [vmem:[#allocation4 + $0xd8] sm:$0xff]  ;;  %v227_v47 = vld [vmem:[%s2453_s5] sm:$0xff]  ;;  %v444_v53 = vld [vmem:[#allocation4 + $0x108] sm:$0xff] }
  0x1e   :  { %1675 = vmatpush1.bf16.msra.mxu1 %v2130_v25  ;;  %v2159_v48 = vpack.c.bf16 %v438_v46, %v435_v45  ;;  %v442_v49 = vld [vmem:[#allocation4 + $0xf8] sm:$0xff]  ;;  %v445_v50 = vld [vmem:[#allocation4 + $0x110] sm:$0xff]  ;;  %v448_v55 = vld [vmem:[#allocation4 + $0x128] sm:$0xff]  ;;  %v232_v46 = vlaneseq }
  0x1f   :  { %1667 = vmatpush3.bf16.msra.mxu0 %v1666_v11  ;;  %1677 = vmatprep.subr.bf16.mxu1 %v2133_v26  ;;  %v2164_v51 = vpack.c.bf16 %v445_v50, %v442_v49  ;;  %v441_v52 = vld [vmem:[#allocation4 + $0xf0] sm:$0xff]  ;;  %v451_v56 = vld [vmem:[#allocation4 + $0x140] sm:$0xff]  ;;  %v450_v59 = vld [vmem:[#allocation4 + $0x138] sm:$0xff] }
  0x20   :  { %251 = vmatprep.subr.mxu0 %v228_v43  ;;  %v2166_v54 = vpack.c.bf16 %v444_v53, %v441_v52  ;;  %v2170_v57 = vpack.c.bf16 %v451_v56, %v448_v55  ;;  %v447_v58 = vld [vmem:[#allocation4 + $0x120] sm:$0xff]  ;;  %v454_v61 = vld [vmem:[#allocation4 + $0x158] sm:$0xff]  ;;  %v457_v62 = vld [vmem:[#allocation4 + $0x170] sm:$0xff] }
  0x21   :  { %v2172_v60 = vpack.c.bf16 %v450_v59, %v447_v58  ;;  %v2176_v63 = vpack.c.bf16 %v457_v62, %v454_v61  ;;  %v453_v2 = vld [vmem:[#allocation4 + $0x150] sm:$0xff]  ;;  %v456_v3 = vld [vmem:[#allocation4 + $0x168] sm:$0xff]  ;;  %v229_v10 = vld [vmem:[%s2453_s5 + $0x10] sm:$0xff] }
  0x22   :  { %1679 = vmatpush1.bf16.msra.mxu1 %v2136_v29  ;;  %v2178_v4 = vpack.c.bf16 %v456_v3, %v453_v2  ;;  %v1343_v5 = vld [vmem:[%s2452_s4] ss:$0 sm:$0xff]  ;;  %v416_v12 = vld [vmem:[#allocation4 + $0x28] sm:$0xff]  ;;  %v419_v14 = vld [vmem:[#allocation4 + $0x40] sm:$0xff] }
  0x23   :  { %1681 = vmatprep.subr.bf16.mxu1 %v2145_v37  ;;  %v413_v11 = vld [vmem:[#allocation4 + $0x10] sm:$0xff]  ;;  %v422_v16 = vld [vmem:[#allocation4 + $0x58] sm:$0xff]  ;;  %v428_v21 = vld [vmem:[#allocation4 + $0x88] sm:$0xff] }
  0x24   :  { %v2209_v13 = vpack.c.bf16 %v416_v12, %v413_v11  ;;  %v2213_v17 = vpack.c.bf16 %v422_v16, %v419_v14  ;;  %v425_v18 = vld [vmem:[#allocation4 + $0x70] sm:$0xff]  ;;  %v431_v23 = vld [vmem:[#allocation4 + $0xa0] sm:$0xff]  ;;  %v434_v24 = vld [vmem:[#allocation4 + $0xb8] sm:$0xff] }
  0x25   :  { %v2219_v22 = vpack.c.bf16 %v428_v21, %v425_v18  ;;  %v2223_v27 = vpack.c.bf16 %v434_v24, %v431_v23  ;;  %v437_v28 = vld [vmem:[#allocation4 + $0xd0] sm:$0xff]  ;;  %v452_v36 = vld [vmem:[#allocation4 + $0x148] sm:$0xff]  ;;  %v455_v39 = vld [vmem:[#allocation4 + $0x160] sm:$0xff] }
  0x26   :  { %1683 = vmatpush1.bf16.msra.mxu1 %v2147_v40  ;;  %v449_v35 = vld [vmem:[#allocation4 + $0x130] sm:$0xff]  ;;  %v458_v41 = vld [vmem:[#allocation4 + $0x178] sm:$0xff] }
  0x27   :  { %1685 = vmatprep.subr.bf16.mxu1 %v2154_v44  ;;  %v2235_v38 = vpack.c.bf16 %v452_v36, %v449_v35  ;;  %v2239_v42 = vpack.c.bf16 %v458_v41, %v455_v39  ;;  %v230_v50 = vld [vmem:[%s2454_s6] sm:$0x7] }
  0x2a   :  { %1687 = vmatpush1.bf16.msra.mxu1 %v2159_v48 }
  0x2b   :  { %1689 = vmatprep.subr.bf16.mxu1 %v2164_v51 }
  0x2e   :  { %1691 = vmatpush1.bf16.msra.mxu1 %v2166_v54 }
  0x2f   :  { %1693 = vmatprep.subr.bf16.mxu1 %v2170_v57 }
  0x32   :  { %1695 = vmatpush1.bf16.msra.mxu1 %v2172_v60 }
  0x33   :  { %1697 = vmatprep.subr.bf16.mxu1 %v2176_v63 }
  0x36   :  { %1699 = vmatpush1.bf16.msra.mxu1 %v2178_v4 }
  0x37   :  { %1725 = vmatprep.subr.bf16.mxu1 %v2122_v15 }
  0x39   :  { %541 = vmatmul.mubr.f32.vlgmr.msra.gmra.mrb[0].mxu1 %v2014_v1 }
  0x3a   :  { %1727 = vmatpush1.bf16.msra.mxu1 %v2124_v19  ;;  %712 = vmatprep.mubr.f32.mxu1 %v2014_v1 }
  0x3b   :  { %1729 = vmatprep.subr.bf16.mxu1 %v2126_v20 }
  0x3e   :  { %1731 = vmatpush1.bf16.msra.mxu1 %v2130_v25 }
  0x3f   :  { %1733 = vmatprep.subr.bf16.mxu1 %v2133_v26 }
  0x42   :  { %1735 = vmatpush1.bf16.msra.mxu1 %v2136_v29 }
  0x43   :  { %1737 = vmatprep.subr.bf16.mxu1 %v2145_v37 }
  0x46   :  { %1739 = vmatpush1.bf16.msra.mxu1 %v2147_v40 }
  0x47   :  { %1741 = vmatprep.subr.bf16.mxu1 %v2154_v44 }
  0x4a   :  { %1743 = vmatpush1.bf16.msra.mxu1 %v2159_v48 }
  0x4b   :  { %1745 = vmatprep.subr.bf16.mxu1 %v2164_v51 }
  0x4e   :  { %1747 = vmatpush1.bf16.msra.mxu1 %v2166_v54 }
  0x4f   :  { %1749 = vmatprep.subr.bf16.mxu1 %v2170_v57 }
  0x52   :  { %1751 = vmatpush1.bf16.msra.mxu1 %v2172_v60 }
  0x53   :  { %1753 = vmatprep.subr.bf16.mxu1 %v2176_v63 }
  0x56   :  { %1755 = vmatpush1.bf16.msra.mxu1 %v2178_v4 }
  0x57   :  { %1781 = vmatprep.subr.bf16.mxu1 %v2122_v15 }
  0xed   :  { %v136_v31 = vpop.f32.mrb[0].mxu0 }
  0xee   :  { %v137_v32 = vadd.f32 %v1341_v30, %v136_v31  ;;  %v1456_v33 = vpop.f32.mrb[1].mxu0  ;;  %v440_v30 = vld [vmem:[#allocation4 + $0xe8] sm:$0xff] }
  0xef   :  { %v2227_v31 = vpack.c.bf16 %v440_v30, %v437_v28  ;;  %v446_v33 = vld [vmem:[#allocation4 + $0x118] sm:$0xff] }
  0xf0   :  { %v140_v34 = vmax.f32 %v137_v32, 0.0  ;;  %v443_v32 = vld [vmem:[#allocation4 + $0x100] sm:$0xff] }
  0xf2   :  { %1466 = vmatmul.mubr.msk.f32.vlgmr.msra.gmra.mrb[2].mxu0 %vm152_vm2, %v140_v34  ;;  %v2231_v34 = vpack.c.bf16 %v446_v33, %v443_v32 }
  0xf3   :  { %315 = vmatprep.mubr.f32.mxu0 %v2014_v1  ;;  %252 = vmatpush1.msra.mxu0 %v227_v47  ;;  %v233_v47 = vshrl.u32 %v232_v46, 7 }
  0xf4   :  { %1468 = vmatprep.subr.mxu0 %v2014_v1 }
  0xf5   :  { %v2263_v49 = vsub.s32 0, %v233_v47  ;;  %v2268_v52 = vsub.s32 1, %v233_v47  ;;  %v2271_v55 = vsub.s32 2, %v233_v47 }
  0xf7   :  { %v235_v53 = vrot.slane %v230_v50, %v2263_v49  ;;  %v239_v56 = vrot.slane %v230_v50, %v2268_v52  ;;  %v243_v62 = vrot.slane %v230_v50, %v2271_v55 }
 0x10c   :  { %v542_v43 = vpop.f32.mrb[0].mxu1 }
 0x10d   :  { %v544_v45 = vpop.f32.mrb[1].mxu1 }
 0x1c5   :  { %v222_v6 = vpop.f32.mrb[2].mxu0 }
 0x1c6   :  { %v223_v7 = vadd.f32 %v1343_v5, %v222_v6  ;;  %v1467_v8 = vpop.f32.mrb[3].mxu0 }
 0x1c8   :  { %v226_v9 = vmax.f32 %v223_v7, 0.0 }
 0x1ca   :  { %1345 = vmatmul.mubr.msk.f32.vlgmr.msra.gmra.mrb[4].mxu0 %vm247_vm3, %v226_v9 }
 0x1cb   :  { %1469 = vmatpush3.msra.mxu0 %v229_v10  ;;  %1470 = vmatprep.mubr.msk.f32.mxu0 %vm2013_vm0, %v2014_v1 }
 0x1cc   :  { %1700 = vmatprep.subr.bf16.mxu0 %v2012_v0 }
 0x1ce   :  { %1471 = vmatmul.mubr.msk.f32.vlgmr.msra.gmra.mrb[6].mxu0 %vm247_vm3, %v226_v9 }
 0x1cf   :  { %1702 = vmatpush3.bf16.msra.mxu0 %v2209_v13  ;;  %1505 = vmatprep.mubr.msk.f32.mxu0 %vm2013_vm0, %v2014_v1 }
 0x1d0   :  { %1703 = vmatprep.subr.bf16.mxu0 %v2012_v0 }
 0x1d3   :  { %1705 = vmatpush3.bf16.msra.mxu0 %v2213_v17 }
 0x1d4   :  { %1706 = vmatprep.subr.bf16.mxu0 %v2012_v0 }
 0x1d7   :  { %1708 = vmatpush3.bf16.msra.mxu0 %v2219_v22 }
 0x1d8   :  { %1709 = vmatprep.subr.bf16.mxu0 %v2012_v0 }
 0x1db   :  { %1711 = vmatpush3.bf16.msra.mxu0 %v2223_v27 }
 0x1dc   :  { %1712 = vmatprep.subr.bf16.mxu0 %v2012_v0 }
 0x1df   :  { %1714 = vmatpush3.bf16.msra.mxu0 %v2227_v31 }
 0x1e0   :  { %1715 = vmatprep.subr.bf16.mxu0 %v2012_v0 }
 0x1e3   :  { %1717 = vmatpush3.bf16.msra.mxu0 %v2231_v34 }
 0x1e4   :  { %1718 = vmatprep.subr.bf16.mxu0 %v2012_v0 }
 0x1e7   :  { %1720 = vmatpush3.bf16.msra.mxu0 %v2235_v38 }
 0x1e8   :  { %1721 = vmatprep.subr.bf16.mxu0 %v2012_v0 }
 0x1eb   :  { %1723 = vmatpush3.bf16.msra.mxu0 %v2239_v42 }
 0x1ec   :  { %1756 = vmatprep.subr.bf16.mxu0 %v2012_v0 }
 0x1ee   :  { %1506 = vmatmul.mubr.f32.vlgmr.msra.gmra.mrb[8].mxu0 %v2014_v1 }
 0x1ef   :  { %1758 = vmatpush3.bf16.msra.mxu0 %v2209_v13  ;;  %1540 = vmatprep.mubr.msk.f32.mxu0 %vm2013_vm0, %v2014_v1 }
 0x1f0   :  { %1759 = vmatprep.subr.bf16.mxu0 %v2012_v0 }
 0x1f3   :  { %1761 = vmatpush3.bf16.msra.mxu0 %v2213_v17 }
 0x1f4   :  { %1762 = vmatprep.subr.bf16.mxu0 %v2012_v0 }
 0x1f7   :  { %1764 = vmatpush3.bf16.msra.mxu0 %v2219_v22 }
 0x1f8   :  { %1765 = vmatprep.subr.bf16.mxu0 %v2012_v0 }
 0x1fb   :  { %1767 = vmatpush3.bf16.msra.mxu0 %v2223_v27 }
 0x1fc   :  { %1768 = vmatprep.subr.bf16.mxu0 %v2012_v0 }
 0x1ff   :  { %1770 = vmatpush3.bf16.msra.mxu0 %v2227_v31 }
 0x200   :  { %1771 = vmatprep.subr.bf16.mxu0 %v2012_v0 }
 0x203   :  { %1773 = vmatpush3.bf16.msra.mxu0 %v2231_v34 }
 0x204   :  { %1774 = vmatprep.subr.bf16.mxu0 %v2012_v0 }
 0x207   :  { %1776 = vmatpush3.bf16.msra.mxu0 %v2235_v38 }
 0x208   :  { %1777 = vmatprep.subr.bf16.mxu0 %v2012_v0 }
 0x20b   :  { %1779 = vmatpush3.bf16.msra.mxu0 %v2239_v42 }
 0x20c   :  { %1812 = vmatprep.subr.bf16.mxu0 %v2012_v0 }
 0x29d   :  { %v317_v58 = vpop.f32.mrb[4].mxu0 }
 0x29e   :  { %v318_v59 = vadd.f32 %v317_v58, %v235_v53  ;;  %v319_v61 = vpop.f32.mrb[5].mxu0 }
 0x29f   :  { %v320_v2 = vadd.f32 %v319_v61, %v239_v56 }
 0x2a1   :  { %v394_v3 = vcombine.low %v318_v59, %v320_v2  ;;  %v388_v5 = vpop.f32.mrb[6].mxu0 }
 0x2a2   :  { %v389_v6 = vadd.f32 %v388_v5, %v243_v62  ;;  %v1472_v7 = vpop.f32.mrb[7].mxu0 }
 0x2a3   :  { %396 = vst [vmem:[#allocation2] sm:$0xff] %v394_v3 }
 0x2a4   :  { %397 = vst [vmem:[#allocation2 + $0x8] sm:$0xf] %v389_v6 }
 0x2ab   :  { %v459_v8 = vld [vmem:[#allocation2] ss:$4 sm:$0x7] }
 0x2ac   :  { %v464_v9 = vrot.slane %v459_v8, %v2263_v49  ;;  %v472_v11 = vrot.slane %v459_v8, %v2271_v55  ;;  %v468_v12 = vrot.slane %v459_v8, %v2268_v52 }
 0x2ae   :  { %v543_v10 = vadd.f32 %v542_v43, %v464_v9  ;;  %v545_v21 = vadd.f32 %v544_v45, %v468_v12  ;;  %v631_v43 = vld [vmem:[#allocation2 + $0x1] ss:$4 sm:$0x7] }
 0x2af   :  { %v636_v45 = vrot.slane %v631_v43, %v2263_v49  ;;  %v644_v53 = vrot.slane %v631_v43, %v2271_v55  ;;  %v640_v61 = vrot.slane %v631_v43, %v2268_v52  ;;  %v1159_v43 = vld [vmem:[%s2456_s8 + $0x60] sm:$0xff] }
 0x2b0   :  { %1929 = vtanh.f32 %v543_v10 }
 0x2ba   :  { %v1930_v23 = vpop.eup %1929 }
 0x2bb   :  { %v620_v24 = vmul.f32 0.5, %v1930_v23 }
 0x2bd   :  { %v623_v28 = vadd.f32 0.5, %v620_v24  ;;  %v1153_v24 = vld [vmem:[%s2456_s8 + $0x30] sm:$0xff] }
 0x2c1   :  { %v613_v14 = vpop.f32.mrb[8].mxu0 }
 0x2c2   :  { %v614_v16 = vadd.f32 %v613_v14, %v472_v11  ;;  %v1507_v18 = vpop.f32.mrb[9].mxu0  ;;  %v1149_v14 = vld [vmem:[%s2456_s8 + $0x10] sm:$0xff] }
 0x2c3   :  { %v1151_v18 = vld [vmem:[%s2456_s8 + $0x20] sm:$0xff] }
 0x2c4   :  { %1931 = vtanh.f32 %v614_v16 }
 0x2c5   :  { %1933 = vtanh.f32 %v545_v21  ;;  %v1152_v21 = vld [vmem:[%s2456_s8 + $0x28] sm:$0xff] }
 0x2c6   :  { %v1899_v23 = vpack.c.bf16 %v1152_v21, %v1151_v18 }
 0x2ce   :  { %v1932_v30 = vpop.eup %1931 }
 0x2cf   :  { %v626_v32 = vmul.f32 %v1932_v30, %v623_v28  ;;  %v1934_v33 = vpop.eup %1933  ;;  %v1154_v28 = vld [vmem:[%s2456_s8 + $0x38] sm:$0xff] }
 0x2d0   :  { %v621_v35 = vmul.f32 0.5, %v1934_v33  ;;  %v1902_v30 = vpack.c.bf16 %v1154_v28, %v1153_v24  ;;  %v1156_v33 = vld [vmem:[%s2456_s8 + $0x48] sm:$0xff] }
 0x2d1   :  { %1935 = vtanh.f32 %v626_v32  ;;  %v1155_v32 = vld [vmem:[%s2456_s8 + $0x40] sm:$0xff] }
 0x2d2   :  { %v624_v36 = vadd.f32 0.5, %v621_v35  ;;  %v1905_v35 = vpack.c.bf16 %v1156_v33, %v1155_v32 }
 0x2db   :  { %v1936_v39 = vpop.eup %1935 }
 0x2dc   :  { %v628_v41 = vmul.f32 %v1936_v39, %v624_v36  ;;  %v1157_v36 = vld [vmem:[%s2456_s8 + $0x50] sm:$0xff]  ;;  %v1158_v39 = vld [vmem:[%s2456_s8 + $0x58] sm:$0xff] }
 0x2de   :  { %629 = vst [vmem:[#allocation3] sm:$0x1] %v628_v41  ;;  %713 = vmatmul.mubr.f32.vlgmr.msra.gmra.mrb[2].mxu1 %v628_v41  ;;  %1541 = vmatmul.mubr.f32.vlgmr.msra.gmra.mrb[10].mxu0 %v628_v41  ;;  %v1908_v41 = vpack.c.bf16 %v1158_v39, %v1157_v36 }
 0x2df   :  { %1783 = vmatpush1.bf16.msra.mxu1 %v2124_v19  ;;  %1814 = vmatpush3.bf16.msra.mxu0 %v2209_v13 }
 0x2e0   :  { %1785 = vmatprep.subr.bf16.mxu1 %v2126_v20  ;;  %1815 = vmatprep.subr.bf16.mxu0 %v2012_v0 }
 0x2e1   :  { %884 = vmatprep.mubr.f32.mxu1 %v2014_v1  ;;  %1575 = vmatprep.mubr.msk.f32.mxu0 %vm2013_vm0, %v2014_v1 }
 0x2e3   :  { %1787 = vmatpush1.bf16.msra.mxu1 %v2130_v25  ;;  %1817 = vmatpush3.bf16.msra.mxu0 %v2213_v17 }
 0x2e4   :  { %1789 = vmatprep.subr.bf16.mxu1 %v2133_v26  ;;  %1818 = vmatprep.subr.bf16.mxu0 %v2012_v0 }
 0x2e7   :  { %1791 = vmatpush1.bf16.msra.mxu1 %v2136_v29  ;;  %1820 = vmatpush3.bf16.msra.mxu0 %v2219_v22 }
 0x2e8   :  { %1793 = vmatprep.subr.bf16.mxu1 %v2145_v37  ;;  %1821 = vmatprep.subr.bf16.mxu0 %v2012_v0 }
 0x2eb   :  { %1795 = vmatpush1.bf16.msra.mxu1 %v2147_v40  ;;  %1823 = vmatpush3.bf16.msra.mxu0 %v2223_v27 }
 0x2ec   :  { %1797 = vmatprep.subr.bf16.mxu1 %v2154_v44  ;;  %1824 = vmatprep.subr.bf16.mxu0 %v2012_v0 }
 0x2ef   :  { %1799 = vmatpush1.bf16.msra.mxu1 %v2159_v48  ;;  %1826 = vmatpush3.bf16.msra.mxu0 %v2227_v31 }
 0x2f0   :  { %1801 = vmatprep.subr.bf16.mxu1 %v2164_v51  ;;  %1827 = vmatprep.subr.bf16.mxu0 %v2012_v0 }
 0x2f3   :  { %1803 = vmatpush1.bf16.msra.mxu1 %v2166_v54  ;;  %1829 = vmatpush3.bf16.msra.mxu0 %v2231_v34 }
 0x2f4   :  { %1805 = vmatprep.subr.bf16.mxu1 %v2170_v57  ;;  %1830 = vmatprep.subr.bf16.mxu0 %v2012_v0 }
 0x2f7   :  { %1807 = vmatpush1.bf16.msra.mxu1 %v2172_v60  ;;  %1832 = vmatpush3.bf16.msra.mxu0 %v2235_v38 }
 0x2f8   :  { %1809 = vmatprep.subr.bf16.mxu1 %v2176_v63  ;;  %1833 = vmatprep.subr.bf16.mxu0 %v2012_v0 }
 0x2fb   :  { %1811 = vmatpush1.bf16.msra.mxu1 %v2178_v4  ;;  %1835 = vmatpush3.bf16.msra.mxu0 %v2239_v42 }
 0x2fc   :  { %1837 = vmatprep.subr.bf16.mxu1 %v2122_v15  ;;  %1868 = vmatprep.subr.bf16.mxu0 %v2012_v0 }
 0x3b1   :  { %v714_v46 = vpop.f32.mrb[2].mxu1  ;;  %v785_v47 = vpop.f32.mrb[10].mxu0 }
 0x3b2   :  { %v715_v50 = vadd.f32 %v714_v46, %v636_v45  ;;  %v716_v56 = vpop.f32.mrb[3].mxu1  ;;  %v1542_v58 = vpop.f32.mrb[11].mxu0  ;;  %v786_v59 = vadd.f32 %v785_v47, %v644_v53  ;;  %v1160_v45 = vld [vmem:[%s2456_s8 + $0x68] sm:$0xff]  ;;  %v1161_v46 = vld [vmem:[%s2456_s8 + $0x70] sm:$0xff] }
 0x3b3   :  { %v717_v62 = vadd.f32 %v716_v56, %v640_v61  ;;  %v1911_v47 = vpack.c.bf16 %v1160_v45, %v1159_v43  ;;  %v1241_v56 = vld [vmem:[%s2458_s10] sm:$0xff]  ;;  %v1242_v58 = vld [vmem:[%s2458_s10 + $0x8] sm:$0xff] }
 0x3b4   :  { %1937 = vtanh.f32 %v715_v50  ;;  %v1162_v50 = vld [vmem:[%s2456_s8 + $0x78] sm:$0xff]  ;;  %v975_v61 = vld [vmem:[#allocation2 + $0x3] ss:$4 sm:$0x7] }
 0x3b5   :  { %1939 = vtanh.f32 %v786_v59  ;;  %v1914_v53 = vpack.c.bf16 %v1162_v50, %v1161_v46  ;;  %v1917_v59 = vpack.c.bf16 %v1242_v58, %v1241_v56 }
 0x3b6   :  { %1941 = vtanh.f32 %v717_v62  ;;  %v980_v62 = vrot.slane %v975_v61, %v2263_v49 }
 0x3be   :  { %v1938_v15 = vpop.eup %1937 }
 0x3bf   :  { %v792_v2 = vmul.f32 0.5, %v1938_v15  ;;  %v1940_v5 = vpop.eup %1939 }
 0x3c0   :  { %v1942_v7 = vpop.eup %1941 }
 0x3c1   :  { %v795_v3 = vadd.f32 0.5, %v792_v2  ;;  %v793_v8 = vmul.f32 0.5, %v1942_v7 }
 0x3c3   :  { %v798_v6 = vmul.f32 %v1940_v5, %v795_v3  ;;  %v796_v9 = vadd.f32 0.5, %v793_v8  ;;  %v988_v5 = vrot.slane %v975_v61, %v2271_v55 }
 0x3c5   :  { %1943 = vtanh.f32 %v798_v6 }
 0x3cf   :  { %v1944_v10 = vpop.eup %1943 }
 0x3d0   :  { %v800_v11 = vmul.f32 %v1944_v10, %v796_v9  ;;  %v984_v9 = vrot.slane %v975_v61, %v2268_v52 }
 0x3d2   :  { %801 = vst [vmem:[#allocation3 + $0x1] sm:$0x1] %v800_v11  ;;  %885 = vmatmul.mubr.f32.vlgmr.msra.gmra.mrb[4].mxu1 %v800_v11  ;;  %1576 = vmatmul.mubr.f32.vlgmr.msra.gmra.mrb[12].mxu0 %v800_v11 }
 0x3d3   :  { %1839 = vmatpush1.bf16.msra.mxu1 %v2124_v19  ;;  %1870 = vmatpush3.bf16.msra.mxu0 %v2209_v13  ;;  %v803_v19 = vld [vmem:[#allocation2 + $0x2] ss:$4 sm:$0x7] }
 0x3d4   :  { %1841 = vmatprep.subr.bf16.mxu1 %v2126_v20  ;;  %1871 = vmatprep.subr.bf16.mxu0 %v2012_v0  ;;  %v808_v20 = vrot.slane %v803_v19, %v2263_v49 }
 0x3d5   :  { %1056 = vmatprep.mubr.f32.mxu1 %v2014_v1  ;;  %1610 = vmatprep.mubr.msk.f32.mxu0 %vm2013_vm0, %v2014_v1 }
 0x3d7   :  { %1843 = vmatpush1.bf16.msra.mxu1 %v2130_v25  ;;  %1873 = vmatpush3.bf16.msra.mxu0 %v2213_v17 }
 0x3d8   :  { %1845 = vmatprep.subr.bf16.mxu1 %v2133_v26  ;;  %1874 = vmatprep.subr.bf16.mxu0 %v2012_v0 }
 0x3db   :  { %1847 = vmatpush1.bf16.msra.mxu1 %v2136_v29  ;;  %1876 = vmatpush3.bf16.msra.mxu0 %v2219_v22 }
 0x3dc   :  { %1849 = vmatprep.subr.bf16.mxu1 %v2145_v37  ;;  %1877 = vmatprep.subr.bf16.mxu0 %v2012_v0  ;;  %v816_v37 = vrot.slane %v803_v19, %v2271_v55 }
 0x3df   :  { %1851 = vmatpush1.bf16.msra.mxu1 %v2147_v40  ;;  %1879 = vmatpush3.bf16.msra.mxu0 %v2223_v27 }
 0x3e0   :  { %1853 = vmatprep.subr.bf16.mxu1 %v2154_v44  ;;  %1880 = vmatprep.subr.bf16.mxu0 %v2012_v0 }
 0x3e3   :  { %1855 = vmatpush1.bf16.msra.mxu1 %v2159_v48  ;;  %1882 = vmatpush3.bf16.msra.mxu0 %v2227_v31 }
 0x3e4   :  { %1857 = vmatprep.subr.bf16.mxu1 %v2164_v51  ;;  %1883 = vmatprep.subr.bf16.mxu0 %v2012_v0  ;;  %v812_v51 = vrot.slane %v803_v19, %v2268_v52  ;;  %v1243_v52 = vld [vmem:[%s2458_s10 + $0x10] sm:$0xff] }
 0x3e7   :  { %1859 = vmatpush1.bf16.msra.mxu1 %v2166_v54  ;;  %1885 = vmatpush3.bf16.msra.mxu0 %v2231_v34 }
 0x3e8   :  { %1861 = vmatprep.subr.bf16.mxu1 %v2170_v57  ;;  %1886 = vmatprep.subr.bf16.mxu0 %v2012_v0 }
 0x3eb   :  { %1863 = vmatpush1.bf16.msra.mxu1 %v2172_v60  ;;  %1888 = vmatpush3.bf16.msra.mxu0 %v2235_v38  ;;  %v1147_v38 = vld [vmem:[%s2456_s8] sm:$0xff] }
 0x3ec   :  { %1865 = vmatprep.subr.bf16.mxu1 %v2176_v63  ;;  %1889 = vmatprep.subr.bf16.mxu0 %v2012_v0 }
 0x3ef   :  { %1867 = vmatpush1.bf16.msra.mxu1 %v2178_v4  ;;  %1891 = vmatpush3.bf16.msra.mxu0 %v2239_v42  ;;  %v1148_v42 = vld [vmem:[%s2456_s8 + $0x8] sm:$0xff] }
 0x3f0   :  { %1892 = vmatprep.subr.bf16.mxu1 %v2012_v0  ;;  %1916 = vmatprep.subr.bf16.mxu0 %v2012_v0  ;;  %v1893_v12 = vpack.c.bf16 %v1148_v42, %v1147_v38 }
 0x4a5   :  { %v886_v25 = vpop.f32.mrb[4].mxu1  ;;  %v957_v26 = vpop.f32.mrb[12].mxu0 }
 0x4a6   :  { %v887_v29 = vadd.f32 %v886_v25, %v808_v20  ;;  %v888_v40 = vpop.f32.mrb[5].mxu1  ;;  %v1577_v44 = vpop.f32.mrb[13].mxu0  ;;  %v958_v48 = vadd.f32 %v957_v26, %v816_v37 }
 0x4a7   :  { %v889_v54 = vadd.f32 %v888_v40, %v812_v51  ;;  %v1244_v44 = vld [vmem:[%s2458_s10 + $0x18] sm:$0xff]  ;;  %v1347_v51 = vld [vmem:[%s2457_s9] ss:$0 sm:$0xff]  ;;  %s1983_s10 = scalar_lea.vmem %s1333_s30, 64 }
 0x4a8   :  { %1945 = vtanh.f32 %v887_v29  ;;  %p1984_p8 = scmp.ne.s32.totalorder %s1333_s30, %s1983_s10  ;;  %p1989_p10 = scmp.lt.s32.totalorder %s1983_s10, %s1983_s10 }
 0x4a9   :  { %1947 = vtanh.f32 %v958_v48  ;;  %v1920_v48 = vpack.c.bf16 %v1244_v44, %v1243_v52 }
 0x4aa   :  { %1949 = vtanh.f32 %v889_v54  ;;  %p1990_p11 = por %p1989_p10, %p1988_p9 }
 0x4ac   :  { %p1991_p12 = pnand %p1990_p11, %p1984_p8 }
 0x4b2   :  { %v1946_v57 = vpop.eup %1945 }
 0x4b3   :  { %v964_v60 = vmul.f32 0.5, %v1946_v57  ;;  %v1948_v4 = vpop.eup %1947 }
 0x4b4   :  { %v1950_v17 = vpop.eup %1949 }
 0x4b5   :  { %v967_v63 = vadd.f32 0.5, %v964_v60  ;;  %v965_v22 = vmul.f32 0.5, %v1950_v17 }
 0x4b7   :  { %v970_v13 = vmul.f32 %v1948_v4, %v967_v63  ;;  %v968_v27 = vadd.f32 0.5, %v965_v22  ;;  %v1348_v4 = vld [vmem:[%s2459_s11] ss:$0 sm:$0xff] }
 0x4b9   :  { %1951 = vtanh.f32 %v970_v13 }
 0x4c3   :  { %v1952_v31 = vpop.eup %1951 }
 0x4c4   :  { %v972_v34 = vmul.f32 %v1952_v31, %v968_v27 }
 0x4c6   :  { %973 = vst [vmem:[#allocation3 + $0x2] sm:$0x1] %v972_v34  ;;  %1057 = vmatmul.mubr.f32.vlgmr.msra.gmra.mrb[6].mxu1 %v972_v34  ;;  %1611 = vmatmul.mubr.f32.vlgmr.msra.gmra.mrb[14].mxu0 %v972_v34 }
 0x4c7   :  { %1645 = vmatprep.mubr.msk.f32.mxu1 %vm2013_vm0, %v2014_v1  ;;  %1656 = vmatprep.mubr.msk.f32.mxu0 %vm2013_vm0, %v2014_v1  ;;  %v1150_v1 = vld [vmem:[%s2456_s8 + $0x18] sm:$0xff] }
 0x4c8   :  { %1894 = vmatpush3.bf16.msra.mxu1 %v1893_v12  ;;  %v1896_v16 = vpack.c.bf16 %v1150_v1, %v1149_v14  ;;  %1918 = vmatpush3.bf16.msra.mxu0 %v1917_v59 }
 0x4c9   :  { %1895 = vmatprep.subr.bf16.mxu1 %v2012_v0  ;;  %1919 = vmatprep.subr.bf16.mxu0 %v2012_v0 }
 0x4cc   :  { %1897 = vmatpush3.bf16.msra.mxu1 %v1896_v16  ;;  %1921 = vmatpush3.bf16.msra.mxu0 %v1920_v48 }
 0x4cd   :  { %1898 = vmatprep.subr.bf16.mxu1 %v2012_v0 }
 0x4d0   :  { %1900 = vmatpush3.bf16.msra.mxu1 %v1899_v23 }
 0x4d1   :  { %1901 = vmatprep.subr.bf16.mxu1 %v2012_v0 }
 0x4d4   :  { %1903 = vmatpush3.bf16.msra.mxu1 %v1902_v30 }
 0x4d5   :  { %1904 = vmatprep.subr.bf16.mxu1 %v2012_v0 }
 0x4d8   :  { %1906 = vmatpush3.bf16.msra.mxu1 %v1905_v35 }
 0x4d9   :  { %1907 = vmatprep.subr.bf16.mxu1 %v2012_v0 }
 0x4dc   :  { %1909 = vmatpush3.bf16.msra.mxu1 %v1908_v41 }
 0x4dd   :  { %1910 = vmatprep.subr.bf16.mxu1 %v2012_v0 }
 0x4e0   :  { %1912 = vmatpush3.bf16.msra.mxu1 %v1911_v47 }
 0x4e1   :  { %1913 = vmatprep.subr.bf16.mxu1 %v2012_v0 }
 0x4e4   :  { %1915 = vmatpush3.bf16.msra.mxu1 %v1914_v53 }
 0x599   :  { %v1058_v15 = vpop.f32.mrb[6].mxu1  ;;  %v1129_v2 = vpop.f32.mrb[14].mxu0 }
 0x59a   :  { %v1059_v3 = vadd.f32 %v1058_v15, %v980_v62  ;;  %v1060_v6 = vpop.f32.mrb[7].mxu1  ;;  %v1612_v7 = vpop.f32.mrb[15].mxu0  ;;  %v1130_v8 = vadd.f32 %v1129_v2, %v988_v5 }
 0x59b   :  { %v1061_v10 = vadd.f32 %v1060_v6, %v984_v9 }
 0x59c   :  { %1953 = vtanh.f32 %v1059_v3 }
 0x59d   :  { %1955 = vtanh.f32 %v1130_v8 }
 0x59e   :  { %1957 = vtanh.f32 %v1061_v10 }
 0x5a6   :  { %v1954_v11 = vpop.eup %1953 }
 0x5a7   :  { %v1136_v19 = vmul.f32 0.5, %v1954_v11  ;;  %v1956_v20 = vpop.eup %1955 }
 0x5a8   :  { %v1958_v49 = vpop.eup %1957 }
 0x5a9   :  { %v1139_v0 = vadd.f32 0.5, %v1136_v19  ;;  %v1137_v26 = vmul.f32 0.5, %v1958_v49 }
 0x5ab   :  { %v1142_v25 = vmul.f32 %v1956_v20, %v1139_v0  ;;  %v1140_v29 = vadd.f32 0.5, %v1137_v26 }
 0x5ad   :  { %1959 = vtanh.f32 %v1142_v25 }
 0x5b7   :  { %v1960_v37 = vpop.eup %1959 }
 0x5b8   :  { %v1144_v55 = vmul.f32 %v1960_v37, %v1140_v29 }
 0x5ba   :  { %1145 = vst [vmem:[#allocation3 + $0x3] sm:$0x1] %v1144_v55 }
 0x5c1   :  { %v1146_v40 = vld [vmem:[#allocation3] sm:$0xf] }
 0x5c2   :  { %1646 = vmatmul.mubr.f32.vlgmr.msra.gmra.mrb[8].mxu1 %v1146_v40 }
 0x695   :  { %v1236_v54 = vpop.f32.mrb[8].mxu1 }
 0x696   :  { %v1237_v57 = vadd.f32 %v1347_v51, %v1236_v54  ;;  %v1647_v60 = vpop.f32.mrb[9].mxu1 }
 0x698   :  { %v1240_v63 = vmax.f32 %v1237_v57, 0.0 }
 0x69a   :  { %1657 = vmatmul.mubr.msk.f32.vlgmr.msra.gmra.mrb[16].mxu0 %vm152_vm2, %v1240_v63 }
 0x76d   :  { %v1321_v13 = vpop.f32.mrb[16].mxu0 }
 0x76e   :  { %v1322_v17 = vadd.f32 %v1348_v4, %v1321_v13  ;;  %v1658_v22 = vpop.f32.mrb[17].mxu0 }
 0x770   :  { %1325 = vst [vmem:[#allocation7] sm:$0xf] %v1322_v17 }
 0x771   :  { %1994 = shalt.err (!%p1991_p12)
}
 0x772   :  { %s1995_s14 = scalar_lea.hbm %s2460_s12, 64 }
 0x773   :  { %p1996_p13 = scmp.ne.s32.totalorder %s2460_s12, %s1995_s14  ;;  %p1999_p0 = scmp.lt.u32.totalorder %s1995_s14, %s2460_s12 }
 0x775   :  { %p2001_p1 = pnand %p1999_p0, %p1996_p13 }
 0x777   :  { %2004 = shalt.err (!%p2001_p1)
}
 0x778   :  { %1335 = dma.vmem_to_hbm [thread:$0]  %s1333_s30, 64, %s2460_s12, [#allocation6]  }
 0x779   :  { %2007 = dma.done.wait [#allocation6], 64  }
 0x77a   :  { %2008 = vsyncadd [#allocation6], 4294967232 }
 0x77b   :  { %1339 = vsyncpa [#allocation5], 1 }
 0x77c   :  { %1340 = vsyncpa [#allocation6], 1 }

</bundles_post_ra>
